<compile_context>
chip_gen: v6e
topology: v6e:2x2x1
jax: 0.10.0
libtpu: 0.0.40
codegen_flags: <defaults>
</compile_context>

<pallas_src>
import functools

import jax
import jax.numpy as jnp
import numpy as np
from jax import lax
from jax.experimental import pallas as pl
from jax.experimental.pallas import tpu as pltpu

_DEFAULT_BLOCK_BYTES = 4 * 1024 * 1024   # ~4 MiB input blocks
_VMEM_LIMIT = 32 * 1024 * 1024           # safe on v5e/v6e/v7x with 4 MiB blocks


def _cdiv(a, b):
    return -(-a // b)


def _round_up(a, b):
    return _cdiv(a, b) * b


# --------------------------------------------------------------------------
# 2-D kernels: reduce the trailing (lane) axis of an (M, K) slab to row means.
# --------------------------------------------------------------------------
def _row_mean_single_kernel(x_ref, o_ref, *, inv_k):
    # Whole reduction axis fits one block: reduce + scale, no accumulator.
    xs = x_ref[...].astype(jnp.float32)
    o_ref[...] = (jnp.sum(xs, axis=1, keepdims=True) * inv_k).astype(o_ref.dtype)


def _row_mean_acc_kernel(x_ref, o_ref, acc_ref, *, kt, k_true, inv_k, mask_tail):
    # Accumulate 128-wide lane partials of each (TM, Kt) block into a resident
    # f32 VMEM accumulator (pure VALU adds); fold across lanes + scale once on
    # the last K block.  Kt is always a multiple of 128 here.
    k_idx = pl.program_id(1)
    n_k = pl.num_programs(1)
    nfull = kt // 128

    @pl.when(k_idx == 0)
    def _init():
        acc_ref[...] = jnp.zeros_like(acc_ref)

    def add_tiles(masked):
        def tile(j):
            xs = x_ref[:, j * 128:(j + 1) * 128].astype(jnp.float32)
            if masked:
                col = (k_idx * kt + j * 128
                       + lax.broadcasted_iota(jnp.int32, xs.shape, 1))
                xs = jnp.where(col < k_true, xs, 0.0)
            return xs

        partial = tile(0)
        for j in range(1, nfull):
            partial = partial + tile(j)
        acc_ref[...] += partial

    if mask_tail:
        # Only the last K block pays for the iota/compare/select.
        @pl.when(k_idx < n_k - 1)
        def _full():
            add_tiles(False)

        @pl.when(k_idx == n_k - 1)
        def _tail():
            add_tiles(True)
    else:
        add_tiles(False)

    @pl.when(k_idx == n_k - 1)
    def _fin():
        o_ref[...] = (jnp.sum(acc_ref[...], axis=1, keepdims=True)
                      * inv_k).astype(o_ref.dtype)


def _row_means_2d(x2, block_bytes):
    """x2: (M, K).  Returns (M,) f32 row means in a single streaming pass."""
    M, K = x2.shape
    itemsize = jnp.dtype(x2.dtype).itemsize

    # Kept-rows tiling: multiple of 8 (or == M), balanced, >= 2 tiles when
    # M >= 16 so the "parallel" axis feeds both v7x TensorCores.
    if M <= 8:
        TM, n_m = M, 1
    else:
        n_m = _cdiv(M, 512)
        if M >= 16:
            n_m = max(n_m, 2)
            if n_m % 2:
                n_m += 1
        TM = min(_round_up(_cdiv(M, n_m), 8), _round_up(M, 8))
        n_m = _cdiv(M, TM)
    Mp = n_m * TM

    inv_k = 1.0 / K
    max_kt = max(128, block_bytes // max(TM * itemsize, 1))

    if K <= max_kt:
        # Whole reduction axis in one block (handles any ragged lane count).
        out = pl.pallas_call(
            functools.partial(_row_mean_single_kernel, inv_k=inv_k),
            out_shape=jax.ShapeDtypeStruct((Mp, 1), jnp.float32),
            grid=(n_m,),
            in_specs=[pl.BlockSpec((TM, K), lambda i: (i, 0))],
            out_specs=pl.BlockSpec((TM, 1), lambda i: (i, 0)),
            compiler_params=pltpu.CompilerParams(
                dimension_semantics=("parallel",),
                vmem_limit_bytes=_VMEM_LIMIT),
        )(x2)
    else:
        # Prefer a multiple-of-128 Kt that divides K (no tail at all).
        cap = max(128, (max_kt // 128) * 128)
        Kt, mask_tail = None, True
        for d in range(cap, 127, -128):
            if K % d == 0:
                Kt, mask_tail = d, False
                break
        if Kt is None:
            Kt = cap
            mask_tail = (K % Kt) != 0
        n_k = _cdiv(K, Kt)

        kern = functools.partial(
            _row_mean_acc_kernel, kt=Kt, k_true=K, inv_k=inv_k,
            mask_tail=mask_tail)
        out = pl.pallas_call(
            kern,
            out_shape=jax.ShapeDtypeStruct((Mp, 1), jnp.float32),
            grid=(n_m, n_k),
            in_specs=[pl.BlockSpec((TM, Kt), lambda i, k: (i, k))],
            out_specs=pl.BlockSpec((TM, 1), lambda i, k: (i, 0)),
            scratch_shapes=[pltpu.VMEM((TM, 128), jnp.float32)],
            compiler_params=pltpu.CompilerParams(
                dimension_semantics=("parallel", "arbitrary"),
                vmem_limit_bytes=_VMEM_LIMIT),
        )(x2)

    # Padded (garbage) rows are discarded here; all kernel ops are row-local.
    return out[:M, 0]


# --------------------------------------------------------------------------
# 3-D kernels: reduce the middle (sublane) axis of an (A, K, B) view.  This
# replaces the HBM transpose for non-trailing reduction axes.
# --------------------------------------------------------------------------
def _mid_mean_single_kernel(x_ref, o_ref, *, inv_k):
    xs = x_ref[...].astype(jnp.float32)               # (TA, K, TB)
    o_ref[...] = (jnp.sum(xs, axis=1) * inv_k).astype(o_ref.dtype)


def _mid_mean_acc_kernel(x_ref, o_ref, acc_ref, *, tk, k_true, inv_k, mask_tail):
    k_idx = pl.program_id(2)
    n_k = pl.num_programs(2)

    @pl.when(k_idx == 0)
    def _init():
        acc_ref[...] = jnp.zeros_like(acc_ref)

    def add(masked):
        xs = x_ref[...].astype(jnp.float32)           # (TA, TK, TB)
        if masked:
            row = (k_idx * tk
                   + lax.broadcasted_iota(jnp.int32, xs.shape[1:], 0))
            xs = jnp.where(row[None, :, :] < k_true, xs, 0.0)
        acc_ref[...] += jnp.sum(xs, axis=1)

    if mask_tail:
        @pl.when(k_idx < n_k - 1)
        def _full():
            add(False)

        @pl.when(k_idx == n_k - 1)
        def _tail():
            add(True)
    else:
        add(False)

    @pl.when(k_idx == n_k - 1)
    def _fin():
        o_ref[...] = (acc_ref[...] * inv_k).astype(o_ref.dtype)


def _mid_means_3d(x3, block_bytes):
    """x3: (A, K, B), reduce the middle axis.  Returns (A, B) f32 means."""
    A, K, B = x3.shape
    itemsize = jnp.dtype(x3.dtype).itemsize

    # Trailing kept axis -> lanes.  Full B when modest, else 512-lane tiles.
    TB = B if B <= 1024 else 512
    n_b = _cdiv(B, TB)
    Bp = n_b * TB
    TBp = _round_up(TB, 128)                # lane padding of a block in VMEM
    row_bytes = TBp * itemsize
    rows_budget = max(8, block_bytes // row_bytes)

    if K <= rows_budget:
        TK, mask_tail = K, False
        a_budget = max(1, block_bytes // max(_round_up(K, 8) * row_bytes, 1))
    else:
        cap = max(8, (rows_budget // 8) * 8)
        TK, mask_tail = None, True
        for d in range(cap, 7, -8):         # prefer a multiple-of-8 divisor
            if K % d == 0:
                TK, mask_tail = d, False
                break
        if TK is None:
            TK = cap
            mask_tail = (K % TK) != 0
        a_budget = 1
    n_k = _cdiv(K, TK)

    # Output-block sublane rule: TA must be a multiple of 8 or equal to A.
    if A <= 8 or a_budget >= A:
        TA = A
    else:
        TA = max(8, (min(A, a_budget) // 8) * 8)
    n_a = _cdiv(A, TA)
    Ap = n_a * TA

    inv_k = 1.0 / K
    if n_k == 1:
        out = pl.pallas_call(
            functools.partial(_mid_mean_single_kernel, inv_k=inv_k),
            out_shape=jax.ShapeDtypeStruct((Ap, Bp), jnp.float32),
            grid=(n_a, n_b),
            in_specs=[pl.BlockSpec((TA, K, TB), lambda i, j: (i, 0, j))],
            out_specs=pl.BlockSpec((TA, TB), lambda i, j: (i, j)),
            compiler_params=pltpu.CompilerParams(
                dimension_semantics=("parallel", "parallel"),
                vmem_limit_bytes=_VMEM_LIMIT),
        )(x3)
    else:
        kern = functools.partial(
            _mid_mean_acc_kernel, tk=TK, k_true=K, inv_k=inv_k,
            mask_tail=mask_tail)
        out = pl.pallas_call(
            kern,
            out_shape=jax.ShapeDtypeStruct((Ap, Bp), jnp.float32),
            grid=(n_a, n_b, n_k),
            in_specs=[pl.BlockSpec((TA, TK, TB), lambda i, j, k: (i, k, j))],
            out_specs=pl.BlockSpec((TA, TB), lambda i, j, k: (i, j)),
            scratch_shapes=[pltpu.VMEM((TA, TB), jnp.float32)],
            compiler_params=pltpu.CompilerParams(
                dimension_semantics=("parallel", "parallel", "arbitrary"),
                vmem_limit_bytes=_VMEM_LIMIT),
        )(x3)

    # Padded rows/cols (ragged edges) are discarded here.
    return out[:A, :B]


# --------------------------------------------------------------------------
# Wrapper with torch.mean semantics.
# --------------------------------------------------------------------------
def _full_reduce_factor(n):
    """Factor n == R*C with R a multiple of 8 and C >= 128 when possible."""
    best_dense, smallest = 0, 0
    r = 8
    limit = min(n, 4096)
    while r <= limit:
        if n % r == 0:
            if smallest == 0:
                smallest = r
            if n // r >= 128:
                best_dense = r
        r += 8
    if best_dense:
        return best_dense, n // best_dense
    if smallest:
        return smallest, n // smallest
    return 1, n                    # e.g. prime sizes: correct, just skinny


def pallas_mean(x, dim=None, keepdim=False, dtype=None, *,
                block_bytes=_DEFAULT_BLOCK_BYTES):
    """torch.mean(x, dim=dim, keepdim=keepdim, dtype=dtype) semantics.

    Accumulation is always f32; the result is cast to `dtype` (or x.dtype).
    `block_bytes` is the per-input-block byte budget (exposed so the
    accumulating / tail-masked code paths can be exercised at small shapes).
    """
    out_dtype = jnp.dtype(dtype) if dtype is not None else x.dtype
    ndim = x.ndim

    if ndim == 0:
        return x.astype(out_dtype)

    # Normalize dim -> sorted unique axes.  An empty dim tuple follows torch's
    # current (deprecation-warned) behaviour: reduce over all dims.
    if dim is None:
        red_axes = tuple(range(ndim))
    elif isinstance(dim, int):
        red_axes = (dim % ndim,)
    else:
        dims = tuple(dim)
        red_axes = (tuple(range(ndim)) if len(dims) == 0
                    else tuple(sorted({d % ndim for d in dims})))

    red_size = int(np.prod([x.shape[a] for a in red_axes])) if red_axes else 1
    if keepdim:
        out_shape = tuple(1 if a in red_axes else x.shape[a]
                          for a in range(ndim))
    else:
        out_shape = tuple(x.shape[a] for a in range(ndim) if a not in red_axes)

    # Edge cases that never reach a kernel (match torch.mean).
    if red_size == 0:
        return jnp.full(out_shape, jnp.nan, dtype=jnp.float32).astype(out_dtype)
    if x.size == 0:
        return jnp.zeros(out_shape, dtype=out_dtype)

    # Full reduction: factor the flat size into a sublane/lane-dense slab so
    # the kernel never streams a single-row input.
    if len(red_axes) == ndim:
        R, C = _full_reduce_factor(x.size)
        row_means = _row_means_2d(x.reshape(R, C), block_bytes)   # (R,) f32
        res = jnp.mean(row_means)               # tiny final reduce (R <= 4096)
        return res.reshape(out_shape).astype(out_dtype)

    # Partial reduction: one streaming pass per maximal contiguous run of
    # reduced axes, processed back to front, with no HBM transpose.
    runs = []
    cur = [red_axes[0]]
    for a in red_axes[1:]:
        if a == cur[-1] + 1:
            cur.append(a)
        else:
            runs.append(cur)
            cur = [a]
    runs.append(cur)

    y = x                                   # first pass streams original dtype
    shape = list(x.shape)
    for run in reversed(runs):
        start, stop = run[0], run[-1] + 1
        A = int(np.prod(shape[:start])) if start > 0 else 1
        K = int(np.prod(shape[start:stop]))
        B = int(np.prod(shape[stop:])) if stop < len(shape) else 1
        if B == 1:
            y = _row_means_2d(y.reshape(A, K), block_bytes)       # (A,) f32
        else:
            y = _mid_means_3d(y.reshape(A, K, B), block_bytes)    # (A, B) f32
        shape = shape[:start] + shape[stop:]
        y = y.reshape(shape)

    return y.reshape(out_shape).astype(out_dtype)


if __name__ == "__main__":
    key = jax.random.PRNGKey(0)
    k1, k2, k3, k4, k5, k6 = jax.random.split(key, 6)

    ok = True

    def check(name, got, want, rtol=1e-5, atol=1e-5):
        global ok
        got = np.asarray(jax.block_until_ready(got), dtype=np.float32)
        want = np.asarray(want, dtype=np.float32)
        if got.shape != want.shape or not np.allclose(got, want,
                                                      rtol=rtol, atol=atol):
            ok = False
            print("MISMATCH:", name, got.shape, want.shape)

    x = jax.random.normal(k1, (2, 4, 16, 16), dtype=jnp.float32)

    cases = [
        dict(dim=None, keepdim=False, dtype=None),          # full mean
        dict(dim=1, keepdim=False, dtype=None),             # no-transpose 3-D
        dict(dim=(2, 3), keepdim=True, dtype=None),         # trailing 2-D
        dict(dim=(0, 2, 3), keepdim=False, dtype=jnp.float32),  # two runs
        dict(dim=-1, keepdim=False, dtype=None),
        dict(dim=0, keepdim=True, dtype=None),
    ]
    for cfg in cases:
        got = pallas_mean(x, **cfg)
        want = jnp.mean(x, axis=cfg["dim"], keepdims=cfg["keepdim"],
                        dtype=cfg["dtype"])
        check("f32 %r" % (cfg,), got, want)

    # Ragged lane count (K not a multiple of 128) inside a single block.
    x_tail = jax.random.normal(k2, (3, 200), dtype=jnp.float32)
    check("ragged K", pallas_mean(x_tail, dim=1), jnp.mean(x_tail, axis=1))

    # bf16 streamed in its original dtype, accumulated in f32 in-kernel.
    x_bf = jax.random.normal(k3, (2, 4, 16, 16), jnp.float32).astype(jnp.bfloat16)
    check("bf16 trailing", pallas_mean(x_bf, dim=(2, 3)),
          jnp.mean(x_bf.astype(jnp.float32), axis=(2, 3)).astype(jnp.bfloat16),
          rtol=2e-2, atol=2e-2)

    # Small block budgets: force the multi-K-block accumulator paths.
    x_acc = jax.random.normal(k4, (16, 1024), dtype=jnp.float32)
    check("2-D acc (Kt divides K)",
          pallas_mean(x_acc, dim=1, block_bytes=16 * 1024),
          jnp.mean(x_acc, axis=1))

    x_mask = jax.random.normal(k5, (16, 1000), dtype=jnp.float32)
    check("2-D acc + lane tail mask",
          pallas_mean(x_mask, dim=1, block_bytes=16 * 1024),
          jnp.mean(x_mask, axis=1))

    x_mid = jax.random.normal(k6, (4, 20, 256), dtype=jnp.float32)
    check("3-D acc + sublane tail mask",
          pallas_mean(x_mid, dim=1, block_bytes=16 * 1024),
          jnp.mean(x_mid, axis=1))
    check("3-D single block", pallas_mean(x_mid, dim=1), jnp.mean(x_mid, axis=1))

    if ok:
        print("KERNEL_OK")
</pallas_src>

<mosaic_0001>
module attributes {stable_mosaic.version = 11 : i64} {
  func.func @_row_mean_single_kernel(%arg0: i32, %arg1: memref<8x128xf32, #tpu.memory_space<vmem>>, %arg2: memref<8x1xf32, #tpu.memory_space<vmem>>) attributes {dimension_semantics = [#tpu.dimension_semantics<parallel>], iteration_bounds = array<i64: 2>, scalar_prefetch = 0 : i64, scratch_operands = 0 : i64, tpu.core_type = #tpu.core_type<tc>, window_params = [{transform_indices = @transform_0, window_bounds = array<i64: 8, 128>}, {transform_indices = @transform_1, window_bounds = array<i64: 8, 1>}]} {
    %c0 = arith.constant 0 : index
    %c0_0 = arith.constant 0 : index
    %0 = vector.load %arg1[%c0, %c0_0] : memref<8x128xf32, #tpu.memory_space<vmem>>, vector<8x128xf32>
    %cst = arith.constant dense<0.000000e+00> : vector<8xf32>
    %1 = vector.multi_reduction <add>, %0, %cst [1] : vector<8x128xf32> to vector<8xf32>
    %2 = vector.shape_cast %1 : vector<8xf32> to vector<8x1xf32>
    %cst_1 = arith.constant 7.812500e-03 : f32
    %3 = vector.broadcast %cst_1 : f32 to vector<8x1xf32>
    %4 = arith.mulf %2, %3 : vector<8x1xf32>
    %c0_2 = arith.constant 0 : index
    %c0_3 = arith.constant 0 : index
    %5 = vector.load %arg2[%c0_2, %c0_3] : memref<8x1xf32, #tpu.memory_space<vmem>>, vector<8x1xf32>
    tpu.vector_store %arg2[%c0_2, %c0_3], %4 {strides = array<i32>} : memref<8x1xf32, #tpu.memory_space<vmem>>, vector<8x1xf32>,
    return
  }
  func.func @transform_0(%arg0: i32) -> (i32, i32) {
    %c0_i32 = arith.constant 0 : i32
    %c0_i32_0 = arith.constant 0 : i32
    return %arg0, %c0_i32 : i32, i32
  }
  func.func @transform_1(%arg0: i32) -> (i32, i32) {
    %c0_i32 = arith.constant 0 : i32
    %c0_i32_0 = arith.constant 0 : i32
    return %arg0, %c0_i32 : i32, i32
  }
}

</mosaic_0001>

<bundles_post_ra>
// kernel: tpu_custom_call.1
= control target key start
LH: loop header
LB: loop body
LE: loop exit
PB: predicated region body
PF: predicated region fallthrough
CT: control target
= control target key end

     0   :  { %6 = vsyncpa [#allocation3], 0  ;;  %s427_s0 = inlined_call_operand.hbm [shape: f32[16,128], index: 0, kind: input, shape index: {}]   ;;  %s428_s1 = inlined_call_operand.vmem [shape: f32[16,1], index: 1, kind: output, shape index: {}]  }
   0x1   :  { %8 = vsyncpa [#allocation3 + $0x1], 0  ;;  %s327_s6 = smov 0   ;;  %s329_s7 = smov 0  }
   0x2   :  { %s331_s8 = smov 0   ;;  %s333_s9 = smov 0  }
   0x3 LB: > { %s346_s10 = sadd.s32 4294967295, %s314_s9   ;;  %s349_s11 = sadd.s32 1, %s314_s9   ;;  %s314_s9 = sphi %s333_s9, %s438_s9   ;;  %s310_s8 = sphi %s331_s8, %s437_s8   ;;  %s306_s7 = sphi %s329_s7, %s436_s7   ;;  %s302_s6 = sphi %s327_s6, %s435_s6  }
   0x4   : > { %s18_s12 = ssub.s32 %s314_s9, %s349_s11  ;;  %s21_s13 = sadd.s32 1, %s310_s8 }
   0x5   : > { %p19_p0 = scmp.eq.s32.totalorder %s18_s12, 0  ;;  %p28_p1 = scmp.ne.s32.totalorder %s310_s8, %s306_s7 }
   0x6   : > { %p29_p2 = scmp.eq.s32.totalorder %s314_s9, 0  ;;  %p34_p3 = scmp.ne.s32.totalorder %s306_s7, %s302_s6 }
   0x7   : > { %s359_s14 = scalar_select %p19_p0, %s310_s8, %s21_s13  }
   0x8   : > { %p30_p4 = por %p29_p2, %p28_p1  ;;  %p35_p5 = scmp.eq.s32.totalorder %s346_s10, 0 }
   0x9   : > { %p219_p6 = scmp.lt.s32.totalorder %s314_s9, 2  ;;  %s84_s16 = sand.u32 1, %s310_s8  }
   0xa   : > { %p363_p7 = por %p35_p5, %p34_p3  ;;  %s206_s17 = sshll.u32 %s84_s16, 3 }
   0xb   : > { %s207_s18 = sshll.u32 %s314_s9, 7  ;;  %s88_s22 = scalar_lea.vmem [#allocation2], %s206_s17 }
   0xc   : > { %s430_s15 = scalar_select %p363_p7, 1, 0 }
   0xd   : > { %s372_s21 = scalar_lea.hbm %s427_s0, %s207_s18  ;;  %s95_s23 = sshll.u32 %s88_s22, 4  ;;  %s374_s23 = int_to_ptr.vmem [resolvable:$true] %s95_s23 }
   0xe   : > { %p376_p8 = pnand %p219_p6, %p30_p4  ;;  %s85_s25 = scalar_lea.sflag [#allocation3], %s84_s16 }
   0xf   : > { %s252_s26 = scalar_lea.hbm %s372_s21, 128  ;;  %s257_s29 = scalar_lea.hbm %s427_s0, 256 }
  0x10   : > { %p253_p11 = scmp.ne.s32.totalorder %s372_s21, %s252_s26  ;;  %p254_p12 = pneg %p376_p8 }
  0x11   : > { %p258_p1 = scmp.lt.s32.totalorder %s372_s21, %s427_s0  ;;  %p259_p2 = scmp.lt.s32.totalorder %s257_s29, %s252_s26 }
  0x12   : > { %p255_p13 = pnand %p254_p12, %p253_p11 }
  0x13   : > { %p260_p3 = por %p259_p2, %p258_p1 }
  0x14   : > { %p256_p0 = pneg %p255_p13 }
  0x16   : > { %p261_p4 = pnand %p260_p3, %p256_p0 }
  0x18   : > { %264 = shalt.err (!%p261_p4)
}
  0x19   : > { %s265_s3 = scalar_lea.vmem %s374_s23, 128  ;;  %s316_s4 = smov [#allocation2]  }
  0x1a   : > { %p266_p5 = scmp.ne.s32.totalorder %s374_s23, %s265_s3  ;;  %s270_s5 = sshll.u32 %s316_s4, 4  ;;  %s271_s5 = int_to_ptr.vmem [resolvable:$false] %s270_s5 }
  0x1b   : > { %s272_s6 = scalar_lea.vmem %s271_s5, 256  ;;  %p273_p13 = scmp.lt.s32.totalorder %s374_s23, %s271_s5 }
  0x1c   : > { %p268_p6 = pnand %p266_p5, %p254_p12  ;;  %p274_p9 = scmp.lt.s32.totalorder %s272_s6, %s265_s3 }
  0x1e   : > { %p269_p11 = pneg %p268_p6  ;;  %p275_p10 = por %p274_p9, %p273_p13 }
  0x20   : > { %p276_p7 = pnand %p275_p10, %p269_p11 }
  0x22   : > { %279 = shalt.err (!%p276_p7)
}
  0x23   : > { %218 = dma.hbm_to_vmem [thread:$0]  (!%p376_p8), %s372_s21, 128, %s374_s23, %s85_s25  }
  0x24   : > { %p432_p0 = scmp.lt.s32.totalorder %s314_s9, 3  ;;  %p433_p1 = scmp.ge.s32.totalorder %s314_s9, 1 }
  0x26   : > { %p101_p12 = pnand %p433_p1, %p432_p0 }
  0x27   : > { %s106_s12 = sand.u32 (!%p101_p12), 1, %s306_s7   ;;  %p434_p9 = scmp.ne.s32.totalorder (!%p101_p12), %s430_s15, 0 }
  0x28   : > { %104 = sbr.rel (%p101_p12) target bundleno = 188 (0xbc), region = 24  ;;  %s209_s13 = sshll.u32 (!%p101_p12), %s106_s12, 3 }
  0x29   : > { %s107_s16 = scalar_lea.sflag (!%p101_p12), [#allocation3], %s106_s12  ;;  %s110_s17 = scalar_lea.vmem (!%p101_p12), [#allocation2], %s209_s13 }
  0x2d   : > { %297 = dma.done.wait (%p434_p9), %s107_s16, 128  }
  0x2e   : > { %299 = vsyncadd (%p434_p9), %s107_s16, 4294967168  ;;  %v132_v0 = vld [vmem:[%s110_s17] sm:$0xff]  ;;  %p128_p7 = scmp.lt.s32.totalorder %s346_s10, 1  ;;  %vm136_vm0 = vcmask 7168  }
  0x2f   : > { %133 = vadd.xlane.f32.xlu0 %v132_v0 }
  0x30   : > { %s440_s10 = smov (!%p128_p7, %s346_s10), 1 }
  0x31   : > { %s210_s9 = sshll.u32 %s440_s10, 3 }
  0x32   : > { %s131_s20 = scalar_lea.vmem %s428_s1, %s210_s9 }
  0xb8   : > { %v134_v1 = vpop.xlane.xlu0 %133 }
  0xb9   : > { %v135_v2 = vmul.f32 0.0078125, %v134_v1 }
  0xbb   : > { %137 = vst.msk [vmem:[%s131_s20] sm:$0xff] %vm136_vm0, %v135_v2 }
  0xbc PF: > { %p11_p8 = scmp.ge.s32.totalorder %s349_s11, 4   ;;  %s435_s6 = smov %s306_s7 }
  0xbd   : > { %s436_s7 = smov %s310_s8  ;;  %s437_s8 = smov %s359_s14 }
  0xbe   : > { %s438_s9 = smov %s349_s11  ;;  %13 = sbr.rel (!%p11_p8) target bundleno = 3 (0x3), region = 64 }
  0xc3   :  { %157 = vsyncpa [#allocation3], 1 }
  0xc4   :  { %159 = vsyncpa [#allocation3 + $0x1], 1 }

</bundles_post_ra>
